<compile_context>
chip_gen: v7x
topology: tpu7x:2x2x1
jax: 0.10.0
libtpu: 0.0.40
codegen_flags: <defaults>
</compile_context>

<pallas_src>
import jax
import jax.numpy as jnp
from jax.experimental import pallas as pl
from jax.experimental.pallas import tpu as pltpu


_LANES = 128
_TARGET_SLAB_ROWS = 2048      # target slab rows per grid step (multiple of 8)
_MIN_GRID_STEPS = 4           # >= 2 steps per TensorCore on v7x megacore
_MIN_ROWS_FOR_PALLAS = 2048   # below this, XLA fusion beats kernel overhead


def _round_up(x, m):
    return ((x + m - 1) // m) * m


def _box_embed_kernel(x_ref, w_ref, b_ref, o_ref):
    """o = ReLU(x @ W + b).  Contraction on the MXU, bias+ReLU on the VPU.

    x_ref: (TS, K)   packed box rows, K = 4 * pack
    w_ref: (K, HP)   block-diagonal packed weight, HP = hidden * pack
    b_ref: (1, HP)   lane-tiled bias
    o_ref: (TS, HP)  lane-dense output slab (HP = 128 when packing)
    """
    y = jnp.dot(x_ref[...], w_ref[...], preferred_element_type=jnp.float32)
    o_ref[...] = jnp.maximum(y + b_ref[...], 0.0).astype(o_ref.dtype)


def _pack_weight(weight, pack):
    """Block-diagonal replication: (4, H) -> (4*pack, H*pack)."""
    if pack == 1:
        return weight
    k, h = weight.shape
    w_pk = jnp.zeros((k * pack, h * pack), weight.dtype)
    for g in range(pack):
        w_pk = w_pk.at[g * k:(g + 1) * k, g * h:(g + 1) * h].set(weight)
    return w_pk


def box_embed_pallas(x_flat, weight, bias, *, out_dtype=None):
    """x_flat: (N, 4), weight: (4, H), bias: (H,) -> (N, H) = ReLU(xW + b)."""
    n, d_in = x_flat.shape
    h = weight.shape[1]
    out_dtype = x_flat.dtype if out_dtype is None else out_dtype

    # Lane packing: fold `pack` consecutive boxes into one 128-lane output row
    # so every store is a full-lane unmasked vst (H=32 -> pack=4 -> HP=128).
    # If H does not divide 128 we fall back to pack=1 (masked stores).
    pack = _LANES // h if (h < _LANES and _LANES % h == 0) else 1
    k = d_in * pack            # packed input width  (<= 16)
    hp = h * pack              # packed output width (128 when packing)

    n_slab = pl.cdiv(n, pack)
    # Adaptive tiling (perf review): >= _MIN_GRID_STEPS steps so v7x's two TCs
    # both get work and the pipeline actually overlaps, ~_TARGET_SLAB_ROWS per
    # step for large N, and tail padding bounded by < ts slab rows.
    num_tiles = max(_MIN_GRID_STEPS, pl.cdiv(n_slab, _TARGET_SLAB_ROWS))
    ts = _round_up(pl.cdiv(n_slab, num_tiles), 8)
    num_tiles = pl.cdiv(n_slab, ts)
    n_slab_pad = ts * num_tiles
    n_pad = n_slab_pad * pack

    if n_pad != n:
        # Padding is now at most (ts*pack - 1) boxes; padded rows produce
        # ReLU(bias) and are sliced off below.
        x_flat = jnp.pad(x_flat, ((0, n_pad - n), (0, 0)))
    x_slab = x_flat.reshape(n_slab_pad, k)           # free row-major reshape

    w_pk = _pack_weight(weight, pack)
    b_pk = jnp.tile(bias, pack).reshape(1, hp)

    out_bytes = jnp.dtype(out_dtype).itemsize
    out_slab = pl.pallas_call(
        _box_embed_kernel,
        out_shape=jax.ShapeDtypeStruct((n_slab_pad, hp), out_dtype),
        grid=(num_tiles,),
        in_specs=[
            pl.BlockSpec((ts, k), lambda i: (i, 0)),
            pl.BlockSpec((k, hp), lambda i: (0, 0)),
            pl.BlockSpec((1, hp), lambda i: (0, 0)),
        ],
        out_specs=pl.BlockSpec((ts, hp), lambda i: (i, 0)),
        compiler_params=pltpu.CompilerParams(
            dimension_semantics=("parallel",)),
        cost_estimate=pl.CostEstimate(
            flops=2 * n_pad * d_in * h + n_pad * h,
            transcendentals=0,
            bytes_accessed=(n_pad * d_in * 4 + k * hp * 4 + hp * 4
                            + n_pad * h * out_bytes)),
    )(x_slab, w_pk, b_pk)

    # Free row-major reshape back to per-box rows, drop padding.
    return out_slab.reshape(n_pad, h)[:n]


def jaad_feature_extractor(inputs, weight, bias, *, out_dtype=None,
                           min_rows_for_pallas=_MIN_ROWS_FOR_PALLAS):
    """JAADFeatureExtractor.forward: ReLU(Linear(4 -> hidden_size)).

    inputs: (..., 4) box coordinates (e.g. (B, T, 4)).
    weight: (4, H) (PyTorch Linear weight transposed), bias: (H,).
    Returns (..., H).
    """
    h = weight.shape[1]
    lead = inputs.shape[:-1]
    x_flat = inputs.reshape(-1, inputs.shape[-1])
    n = x_flat.shape[0]
    if n < min_rows_for_pallas:
        # Tiny N: pallas_call launch/DMA overhead dominates; let XLA fuse it.
        out_flat = jnp.maximum(x_flat @ weight + bias, 0.0)
        if out_dtype is not None:
            out_flat = out_flat.astype(out_dtype)
    else:
        out_flat = box_embed_pallas(x_flat, weight, bias, out_dtype=out_dtype)
    return out_flat.reshape(*lead, h)


def _reference(x, weight, bias):
    """Exact-f32 reference (broadcast FMAs; no matmul-precision ambiguity)."""
    acc = jnp.broadcast_to(bias, x.shape[:-1] + (bias.shape[0],))
    for j in range(x.shape[-1]):
        acc = acc + x[..., j:j + 1] * weight[j]
    return jnp.maximum(acc, 0.0)


if __name__ == "__main__":
    hidden_size = 32    # args.hidden_size
    batch, seq = 2, 8

    key = jax.random.PRNGKey(0)
    k_x, k_w, k_b, k_x2 = jax.random.split(key, 4)

    # Deterministic Linear(4, hidden_size) params (weight stored as (in, out)).
    weight = jax.random.uniform(k_w, (4, hidden_size), jnp.float32,
                                minval=-0.5, maxval=0.5)
    bias = jax.random.uniform(k_b, (hidden_size,), jnp.float32,
                              minval=-0.5, maxval=0.5)

    # Tolerance is loose enough to cover a bf16-pass MXU f32 contraction while
    # still catching packing / bias / ReLU / layout bugs (those are O(1)).
    ATOL = RTOL = 1e-2

    # Small JAAD-like input (B, T, 4); force the Pallas path so the kernel runs.
    x = jax.random.uniform(k_x, (batch, seq, 4), jnp.float32,
                           minval=-1.0, maxval=1.0)
    out = jaad_feature_extractor(x, weight, bias, min_rows_for_pallas=0)
    out = jax.block_until_ready(out)
    ref = _reference(x, weight, bias)
    assert out.shape == (batch, seq, hidden_size)
    assert jnp.allclose(out, ref, atol=ATOL, rtol=RTOL)

    # Larger case: exercises the multi-tile grid (4 steps) and tail padding.
    x2 = jax.random.uniform(k_x2, (2, 2600, 4), jnp.float32,
                            minval=-1.0, maxval=1.0)
    out2 = jax.block_until_ready(jaad_feature_extractor(x2, weight, bias))
    ref2 = _reference(x2, weight, bias)
    assert out2.shape == (2, 2600, hidden_size)
    assert jnp.allclose(out2, ref2, atol=ATOL, rtol=RTOL)

    print("KERNEL_OK")
</pallas_src>

<mosaic_0001>
module attributes {stable_mosaic.version = 11 : i64} {
  func.func @_box_embed_kernel(%arg0: i32, %arg1: memref<8x16xf32, #tpu.memory_space<vmem>>, %arg2: memref<16x128xf32, #tpu.memory_space<vmem>>, %arg3: memref<1x128xf32, #tpu.memory_space<vmem>>, %arg4: memref<8x128xf32, #tpu.memory_space<vmem>>) attributes {dimension_semantics = [#tpu.dimension_semantics<parallel>], iteration_bounds = array<i64: 1>, scalar_prefetch = 0 : i64, scratch_operands = 0 : i64, tpu.core_type = #tpu.core_type<tc>, window_params = [{transform_indices = @transform_0, window_bounds = array<i64: 8, 16>}, {pipeline_mode = #tpu.pipeline_mode<synchronous>, transform_indices = @transform_1, window_bounds = array<i64: 16, 128>}, {pipeline_mode = #tpu.pipeline_mode<synchronous>, transform_indices = @transform_2, window_bounds = array<i64: 1, 128>}, {transform_indices = @transform_3, window_bounds = array<i64: 8, 128>}]} {
    %c0 = arith.constant 0 : index
    %c0_0 = arith.constant 0 : index
    %0 = vector.load %arg1[%c0, %c0_0] : memref<8x16xf32, #tpu.memory_space<vmem>>, vector<8x16xf32>
    %c0_1 = arith.constant 0 : index
    %c0_2 = arith.constant 0 : index
    %1 = vector.load %arg2[%c0_1, %c0_2] : memref<16x128xf32, #tpu.memory_space<vmem>>, vector<16x128xf32>
    %cst = arith.constant dense<0.000000e+00> : vector<8x128xf32>
    %2 = tpu.matmul %0, %1, %cst {dimension_numbers = #tpu.dot_dimension_numbers<[1], [0], [0], [1], [0, 0, 1, 1], [], []>} : vector<8x16xf32>, vector<16x128xf32>, vector<8x128xf32> -> vector<8x128xf32>
    %c0_3 = arith.constant 0 : index
    %c0_4 = arith.constant 0 : index
    %3 = vector.load %arg3[%c0_3, %c0_4] : memref<1x128xf32, #tpu.memory_space<vmem>>, vector<1x128xf32>
    %4 = vector.broadcast %3 : vector<1x128xf32> to vector<8x128xf32>
    %5 = arith.addf %2, %4 : vector<8x128xf32>
    %cst_5 = arith.constant 0.000000e+00 : f32
    %6 = vector.broadcast %cst_5 : f32 to vector<8x128xf32>
    %7 = arith.maximumf %5, %6 : vector<8x128xf32>
    %c0_6 = arith.constant 0 : index
    %c0_7 = arith.constant 0 : index
    %8 = vector.load %arg4[%c0_6, %c0_7] : memref<8x128xf32, #tpu.memory_space<vmem>>, vector<8x128xf32>
    tpu.vector_store %arg4[%c0_6, %c0_7], %7 {strides = array<i32>} : memref<8x128xf32, #tpu.memory_space<vmem>>, vector<8x128xf32>,
    return
  }
  func.func @transform_0(%arg0: i32) -> (i32, i32) {
    %c0_i32 = arith.constant 0 : i32
    %c0_i32_0 = arith.constant 0 : i32
    return %arg0, %c0_i32 : i32, i32
  }
  func.func @transform_1(%arg0: i32) -> (i32, i32) {
    %c0_i32 = arith.constant 0 : i32
    %c0_i32_0 = arith.constant 0 : i32
    %c0_i32_1 = arith.constant 0 : i32
    return %c0_i32, %c0_i32_0 : i32, i32
  }
  func.func @transform_2(%arg0: i32) -> (i32, i32) {
    %c0_i32 = arith.constant 0 : i32
    %c0_i32_0 = arith.constant 0 : i32
    %c0_i32_1 = arith.constant 0 : i32
    return %c0_i32, %c0_i32_0 : i32, i32
  }
  func.func @transform_3(%arg0: i32) -> (i32, i32) {
    %c0_i32 = arith.constant 0 : i32
    %c0_i32_0 = arith.constant 0 : i32
    return %arg0, %c0_i32 : i32, i32
  }
}

</mosaic_0001>

<bundles_post_ra>
// kernel: tpu_custom_call.1
= control target key start
LH: loop header
LB: loop body
LE: loop exit
PB: predicated region body
PF: predicated region fallthrough
CT: control target
= control target key end

     0   :  { %8 = vsyncpa [#allocation3], 0  ;;  %s312_s0 = inlined_call_operand.hbm [shape: f32[8,16], index: 0, kind: input, shape index: {}]   ;;  %s313_s1 = inlined_call_operand.hbm [shape: f32[16,128], index: 1, kind: input, shape index: {}]   ;;  %s314_s2 = inlined_call_operand.vmem [shape: f32[1,128], index: 2, kind: input, shape index: {}]   ;;  %s315_s3 = inlined_call_operand.hbm [shape: f32[8,128], index: 3, kind: output, shape index: {}]  }
   0x1   :  { %9 = vsyncpa [#allocation6], 0 }
   0x2   :  { %10 = vsyncpa [#allocation4], 0  ;;  %s238_s12 = smov [#allocation2]   ;;  %s239_s14 = smov [#allocation5]  }
   0x3   :  { %s17_s13 = sshll.u32 %s238_s12, 4  ;;  %s26_s15 = sshll.u32 %s239_s14, 4  ;;  %s18_s13 = int_to_ptr.vmem [resolvable:$true] %s17_s13  ;;  %s266_s15 = int_to_ptr.vmem [resolvable:$true] %s26_s15 }
   0x4   :  { %s166_s18 = scalar_lea.hbm %s312_s0, 128 }
   0x5   :  { %p167_p0 = scmp.ne.s32.totalorder %s312_s0, %s166_s18  ;;  %p170_p1 = scmp.lt.u32.totalorder %s166_s18, %s312_s0 }
   0x7   :  { %p172_p2 = pnand %p170_p1, %p167_p0 }
   0x9   :  { %175 = shalt.err (!%p172_p2)
}
   0xa   :  { %s176_s23 = scalar_lea.vmem %s18_s13, 128  ;;  %p181_p4 = scmp.lt.s32.totalorder %s18_s13, %s18_s13 }
   0xb   :  { %p177_p3 = scmp.ne.s32.totalorder %s18_s13, %s176_s23  ;;  %p182_p5 = scmp.lt.s32.totalorder %s176_s23, %s176_s23 }
   0xd   :  { %p183_p6 = por %p182_p5, %p181_p4 }
   0xf   :  { %p184_p7 = pnand %p183_p6, %p177_p3 }
  0x11   :  { %187 = shalt.err (!%p184_p7)
}
  0x12   :  { %20 = dma.hbm_to_vmem [thread:$0]  %s312_s0, 128, %s18_s13, [#allocation3]  }
  0x13   :  { %s188_s28 = scalar_lea.hbm %s313_s1, 256 }
  0x14   :  { %p189_p8 = scmp.ne.s32.totalorder %s313_s1, %s188_s28  ;;  %p192_p9 = scmp.lt.u32.totalorder %s188_s28, %s313_s1 }
  0x16   :  { %p194_p10 = pnand %p192_p9, %p189_p8 }
  0x18   :  { %197 = shalt.err (!%p194_p10)
}
  0x19   :  { %s198_s6 = scalar_lea.vmem %s266_s15, 256  ;;  %p203_p12 = scmp.lt.s32.totalorder %s266_s15, %s266_s15 }
  0x1a   :  { %p199_p11 = scmp.ne.s32.totalorder %s266_s15, %s198_s6  ;;  %p204_p13 = scmp.lt.s32.totalorder %s198_s6, %s198_s6 }
  0x1c   :  { %p205_p0 = por %p204_p13, %p203_p12 }
  0x1e   :  { %p206_p1 = pnand %p205_p0, %p199_p11 }
  0x20   :  { %209 = shalt.err (!%p206_p1)
}
  0x21   :  { %s240_s0 = smov 128   ;;  %s241_s7 = smov 8  }
  0x22   :  { %32 = dma.hbm_to_vmem [thread:$0]  %s313_s1, 256, %s266_s15, [#allocation6], %s240_s0, %s240_s0, %s241_s7  }
  0x23   :  { %232 = dma.done.wait [#allocation3], 128  }
  0x24   :  { %233 = vsyncadd [#allocation3], 4294967168 }
  0x25   :  { %234 = dma.done.wait [#allocation6], 256  }
  0x26   :  { %235 = vsyncadd [#allocation6], 4294967040  ;;  %v242_v0 = vmov 0.0|0.0   ;;  %vm243_vm0 = vmmov 0   ;;  %v244_v1 = vmov 0.0   ;;  %v42_v2 = vld [vmem:[#allocation5] sm:$0xff] }
  0x27   :  { %155 = vmatprep.subr.bf16.mxu0 %v242_v0  ;;  %152 = vmatprep.mubr.msk.f32.mxu0 %vm243_vm0, %v244_v1  ;;  %v43_v3 = vld [vmem:[#allocation5 + $0x8] sm:$0xff]  ;;  %v41_v5 = vld [vmem:[#allocation2] sm:$0xff]  ;;  %vm51_vm1 = vcmask 130048   ;;  %s245_s1 = smov [#allocation7]  }
  0x28   :  { %v156_v4 = vpack.c.bf16 %v43_v3, %v42_v2  ;;  %v143_v6 = vld [vmem:[%s314_s2] ss:$0 sm:$0xff]  ;;  %s133_s12 = sshll.u32 %s245_s1, 4  ;;  %s134_s12 = int_to_ptr.vmem [resolvable:$true] %s133_s12 }
  0x29   :  { %s210_s13 = scalar_lea.vmem %s134_s12, 128  ;;  %p215_p3 = scmp.lt.s32.totalorder %s134_s12, %s134_s12 }
  0x2a   :  { %157 = vmatpush3.bf16.msra.mxu0 %v156_v4  ;;  %p211_p2 = scmp.ne.s32.totalorder %s134_s12, %s210_s13  ;;  %p216_p4 = scmp.lt.s32.totalorder %s210_s13, %s210_s13 }
  0x2c   :  { %p217_p5 = por %p216_p4, %p215_p3 }
  0x2d   :  { %153 = vmatmul.mubr.msk.f32.vlgmr.msra.gmra.mrb[0].mxu0 %vm51_vm1, %v41_v5 }
  0x2e   :  { %p218_p6 = pnand %p217_p5, %p211_p2 }
 0x100   :  { %v121_v7 = vpop.f32.mrb[0].mxu0 }
 0x101   :  { %v122_v8 = vadd.f32 %v143_v6, %v121_v7  ;;  %v154_v9 = vpop.f32.mrb[1].mxu0 }
 0x103   :  { %v125_v10 = vmax.f32 %v122_v8, 0.0 }
 0x105   :  { %126 = vst [vmem:[#allocation7] sm:$0xff] %v125_v10 }
 0x106   :  { %221 = shalt.err (!%p218_p6)
}
 0x107   :  { %s222_s16 = scalar_lea.hbm %s315_s3, 128 }
 0x108   :  { %p223_p7 = scmp.ne.s32.totalorder %s315_s3, %s222_s16  ;;  %p226_p8 = scmp.lt.u32.totalorder %s222_s16, %s315_s3 }
 0x10a   :  { %p228_p9 = pnand %p226_p8, %p223_p7 }
 0x10c   :  { %231 = shalt.err (!%p228_p9)
}
 0x10d   :  { %136 = dma.vmem_to_hbm [thread:$0]  %s134_s12, 128, %s315_s3, [#allocation4]  }
 0x10e   :  { %236 = dma.done.wait [#allocation4], 128  }
 0x10f   :  { %237 = vsyncadd [#allocation4], 4294967168 }
 0x110   :  { %140 = vsyncpa [#allocation3], 1 }
 0x111   :  { %141 = vsyncpa [#allocation6], 1 }
 0x112   :  { %142 = vsyncpa [#allocation4], 1 }

</bundles_post_ra>
